<compile_context>
chip_gen: v7x
topology: tpu7x:2x2x1
jax: 0.10.0
libtpu: 0.0.40
codegen_flags: <defaults>
</compile_context>

<pallas_src>
from functools import partial

import jax
import jax.numpy as jnp
import numpy as np
from jax.experimental import pallas as pl
from jax.experimental.pallas import tpu as pltpu

NC_PAD = 128  # lane-pad the tiny 2-class output dim for unmasked vector stores


def _round_up(x, m):
    return ((x + m - 1) // m) * m


def _classifier_kernel(x_ref, w1_ref, b1_ref, gamma_ref, beta_ref,
                       w2_ref, b2_ref, o_ref):
    """Linear -> GeLU -> LayerNorm(eps=1e-12) -> Linear, fused per batch tile."""
    # bf16 operands into the MXU, f32 accumulation.
    x = x_ref[...].astype(jnp.bfloat16)                          # [TB, D]
    h = jnp.dot(x, w1_ref[...], preferred_element_type=jnp.float32)
    h = h + b1_ref[...]                                          # [TB, 2D] f32

    # GeLU (tanh approximation -> EUP; original module uses the erf form).
    g = jax.nn.gelu(h, approximate=True)

    # BertLayerNorm over the last dim, eps = 1e-12 (biased variance), f32.
    mu = jnp.mean(g, axis=-1, keepdims=True)
    d = g - mu
    var = jnp.mean(d * d, axis=-1, keepdims=True)
    ln = d * jax.lax.rsqrt(var + 1e-12)
    ln = ln * gamma_ref[...] + beta_ref[...]                     # [TB, 2D]

    # Linear(2D -> NC_PAD), padded columns are zero and sliced off outside.
    out = jnp.dot(ln.astype(jnp.bfloat16), w2_ref[...],
                  preferred_element_type=jnp.float32)
    out = out + b2_ref[...]
    o_ref[...] = out.astype(o_ref.dtype)


def prepare_classifier_params(w1, b1, gamma, beta, w2, b2):
    """One-time param prep: lane-pad the 2-class head, pre-cast GEMM weights to bf16."""
    D, H = w1.shape
    nc = w2.shape[1]
    w2_p = jnp.zeros((H, NC_PAD), jnp.float32).at[:, :nc].set(w2)
    b2_p = jnp.zeros((1, NC_PAD), jnp.float32).at[:, :nc].set(b2.reshape(1, nc))
    params = (
        w1.astype(jnp.bfloat16),                 # [D, H]   bf16 (MXU input)
        b1.reshape(1, H).astype(jnp.float32),    # [1, H]
        gamma.reshape(1, H).astype(jnp.float32), # [1, H]
        beta.reshape(1, H).astype(jnp.float32),  # [1, H]
        w2_p.astype(jnp.bfloat16),               # [H, 128] bf16 (MXU input)
        b2_p,                                    # [1, 128] f32
    )
    return params, nc


@partial(jax.jit, static_argnames=("block_b",))
def _classifier_head_padded(pooled, w1_bf, b1, gamma, beta, w2_bf, b2, *,
                            block_b):
    B, D = pooled.shape
    H = w1_bf.shape[1]

    # Pick a batch tile: multiple of 8 (sublane) unless it covers the full batch.
    tb = min(block_b, B)
    if tb < B:
        tb = _round_up(tb, 8)
    b_pad = _round_up(B, tb)
    if b_pad != B:
        pooled = jnp.pad(pooled, ((0, b_pad - B), (0, 0)))

    grid = (b_pad // tb,)

    out = pl.pallas_call(
        _classifier_kernel,
        out_shape=jax.ShapeDtypeStruct((b_pad, NC_PAD), jnp.float32),
        grid_spec=pltpu.PrefetchScalarGridSpec(
            num_scalar_prefetch=0,
            grid=grid,
            in_specs=[
                # Streamed per grid step (auto double-buffered).
                pl.BlockSpec((tb, D), lambda i: (i, 0)),
                # Resident across the whole grid.
                pl.BlockSpec((D, H), lambda i: (0, 0)),
                pl.BlockSpec((1, H), lambda i: (0, 0)),
                pl.BlockSpec((1, H), lambda i: (0, 0)),
                pl.BlockSpec((1, H), lambda i: (0, 0)),
                pl.BlockSpec((H, NC_PAD), lambda i: (0, 0)),
                pl.BlockSpec((1, NC_PAD), lambda i: (0, 0)),
            ],
            out_specs=pl.BlockSpec((tb, NC_PAD), lambda i: (i, 0)),
        ),
        compiler_params=pltpu.CompilerParams(
            # Batch tiles are independent -> shard across TCs on v7x megacore.
            dimension_semantics=("parallel",),
            # Above the 16/32 MiB scoped defaults, headroom under v7x's 64 MiB.
            vmem_limit_bytes=48 * 1024 * 1024,
        ),
    )(pooled, w1_bf, b1, gamma, beta, w2_bf, b2)
    return out[:B]


def modelv_classifier_head(pooled, params, num_classes, *, block_b=256):
    """pooled: [B, D] float32; params from prepare_classifier_params.
    Returns logits [B, num_classes]."""
    out = _classifier_head_padded(pooled, *params, block_b=block_b)
    return out[:, :num_classes]


def _reference(pooled, w1, b1, gamma, beta, w2, b2):
    h = pooled @ w1 + b1
    g = 0.5 * h * (1.0 + jax.lax.erf(h / jnp.sqrt(2.0)))  # erf-form GeLU, f32
    mu = jnp.mean(g, axis=-1, keepdims=True)
    var = jnp.mean((g - mu) ** 2, axis=-1, keepdims=True)
    ln = (g - mu) / jnp.sqrt(var + 1e-12) * gamma + beta
    return ln @ w2 + b2


if __name__ == "__main__":
    key = jax.random.PRNGKey(0)
    B, D = 16, 32                # small batch / hidden size for the demo
    H = 2 * D
    NUM_CLASSES = 2
    INIT_RANGE = 0.02            # model.config.initializer_range

    k_x, k_w1, k_w2 = jax.random.split(key, 3)

    # Synthetic pooled BERT output (stands in for the untranslatable encoder).
    pooled = jax.random.normal(k_x, (B, D), jnp.float32)

    # Deterministic parameter init mirroring ModelV.init_weights:
    #   Linear weights ~ N(0, initializer_range), biases = 0,
    #   BertLayerNorm weight = 1, bias = 0.
    w1 = INIT_RANGE * jax.random.normal(k_w1, (D, H), jnp.float32)
    b1 = jnp.zeros((H,), jnp.float32)
    gamma = jnp.ones((H,), jnp.float32)
    beta = jnp.zeros((H,), jnp.float32)
    w2 = INIT_RANGE * jax.random.normal(k_w2, (H, NUM_CLASSES), jnp.float32)
    b2 = jnp.zeros((NUM_CLASSES,), jnp.float32)

    # One-time param prep (padding / bf16 cast hoisted out of the call path).
    params, nc = prepare_classifier_params(w1, b1, gamma, beta, w2, b2)

    # block_b=8 exercises the batch grid (grid=(2,)) at these toy sizes;
    # production callers would use the default 256-row tiles.
    logits = modelv_classifier_head(pooled, params, nc, block_b=8)
    logits = jax.block_until_ready(logits)

    ref = _reference(pooled, w1, b1, gamma, beta, w2, b2)
    assert logits.shape == (B, NUM_CLASSES)
    # Tolerance loosened for bf16 MXU inputs + tanh-approx GeLU vs f32/erf ref.
    np.testing.assert_allclose(np.asarray(logits), np.asarray(ref),
                               rtol=2e-2, atol=2e-2)
    print("KERNEL_OK")
</pallas_src>

<mosaic_0001>
module attributes {stable_mosaic.version = 11 : i64} {
  func.func @_classifier_kernel(%arg0: i32, %arg1: memref<8x32xf32, #tpu.memory_space<vmem>>, %arg2: memref<32x64xbf16, #tpu.memory_space<vmem>>, %arg3: memref<1x64xf32, #tpu.memory_space<vmem>>, %arg4: memref<1x64xf32, #tpu.memory_space<vmem>>, %arg5: memref<1x64xf32, #tpu.memory_space<vmem>>, %arg6: memref<64x128xbf16, #tpu.memory_space<vmem>>, %arg7: memref<1x128xf32, #tpu.memory_space<vmem>>, %arg8: memref<8x128xf32, #tpu.memory_space<vmem>>) attributes {dimension_semantics = [#tpu.dimension_semantics<parallel>], iteration_bounds = array<i64: 2>, scalar_prefetch = 0 : i64, scratch_operands = 0 : i64, tpu.core_type = #tpu.core_type<tc>, window_params = [{transform_indices = @transform_0, window_bounds = array<i64: 8, 32>}, {pipeline_mode = #tpu.pipeline_mode<synchronous>, transform_indices = @transform_1, window_bounds = array<i64: 32, 64>}, {pipeline_mode = #tpu.pipeline_mode<synchronous>, transform_indices = @transform_2, window_bounds = array<i64: 1, 64>}, {pipeline_mode = #tpu.pipeline_mode<synchronous>, transform_indices = @transform_3, window_bounds = array<i64: 1, 64>}, {pipeline_mode = #tpu.pipeline_mode<synchronous>, transform_indices = @transform_4, window_bounds = array<i64: 1, 64>}, {pipeline_mode = #tpu.pipeline_mode<synchronous>, transform_indices = @transform_5, window_bounds = array<i64: 64, 128>}, {pipeline_mode = #tpu.pipeline_mode<synchronous>, transform_indices = @transform_6, window_bounds = array<i64: 1, 128>}, {transform_indices = @transform_7, window_bounds = array<i64: 8, 128>}]} {
    %c0 = arith.constant 0 : index
    %c0_0 = arith.constant 0 : index
    %0 = vector.load %arg1[%c0, %c0_0] : memref<8x32xf32, #tpu.memory_space<vmem>>, vector<8x32xf32>
    %1 = arith.truncf %0 : vector<8x32xf32> to vector<8x32xbf16>
    %c0_1 = arith.constant 0 : index
    %c0_2 = arith.constant 0 : index
    %2 = vector.load %arg2[%c0_1, %c0_2] : memref<32x64xbf16, #tpu.memory_space<vmem>>, vector<32x64xbf16>
    %cst = arith.constant dense<0.000000e+00> : vector<8x64xf32>
    %3 = tpu.matmul %1, %2, %cst {dimension_numbers = #tpu.dot_dimension_numbers<[1], [0], [0], [1], [0, 0, 1, 1], [], []>} : vector<8x32xbf16>, vector<32x64xbf16>, vector<8x64xf32> -> vector<8x64xf32>
    %c0_3 = arith.constant 0 : index
    %c0_4 = arith.constant 0 : index
    %4 = vector.load %arg3[%c0_3, %c0_4] : memref<1x64xf32, #tpu.memory_space<vmem>>, vector<1x64xf32>
    %5 = vector.broadcast %4 : vector<1x64xf32> to vector<8x64xf32>
    %6 = arith.addf %3, %5 : vector<8x64xf32>
    %7 = arith.mulf %6, %6 : vector<8x64xf32>
    %8 = arith.mulf %6, %7 : vector<8x64xf32>
    %cst_5 = arith.constant 4.471500e-02 : f32
    %9 = vector.broadcast %cst_5 : f32 to vector<8x64xf32>
    %10 = arith.mulf %9, %8 : vector<8x64xf32>
    %11 = arith.addf %6, %10 : vector<8x64xf32>
    %cst_6 = arith.constant 0.797884583 : f32
    %12 = vector.broadcast %cst_6 : f32 to vector<8x64xf32>
    %13 = arith.mulf %12, %11 : vector<8x64xf32>
    %14 = math.tanh %13 : vector<8x64xf32>
    %cst_7 = arith.constant 1.000000e+00 : f32
    %15 = vector.broadcast %cst_7 : f32 to vector<8x64xf32>
    %16 = arith.addf %15, %14 : vector<8x64xf32>
    %cst_8 = arith.constant 5.000000e-01 : f32
    %17 = vector.broadcast %cst_8 : f32 to vector<8x64xf32>
    %18 = arith.mulf %17, %16 : vector<8x64xf32>
    %19 = arith.mulf %6, %18 : vector<8x64xf32>
    %cst_9 = arith.constant dense<0.000000e+00> : vector<8xf32>
    %20 = vector.multi_reduction <add>, %19, %cst_9 [1] : vector<8x64xf32> to vector<8xf32>
    %21 = vector.shape_cast %20 : vector<8xf32> to vector<8x1xf32>
    %cst_10 = arith.constant 6.400000e+01 : f32
    %22 = vector.broadcast %cst_10 : f32 to vector<8x1xf32>
    %23 = arith.divf %21, %22 : vector<8x1xf32>
    %24 = vector.broadcast %23 : vector<8x1xf32> to vector<8x64xf32>
    %25 = arith.subf %19, %24 : vector<8x64xf32>
    %26 = arith.mulf %25, %25 : vector<8x64xf32>
    %cst_11 = arith.constant dense<0.000000e+00> : vector<8xf32>
    %27 = vector.multi_reduction <add>, %26, %cst_11 [1] : vector<8x64xf32> to vector<8xf32>
    %28 = vector.shape_cast %27 : vector<8xf32> to vector<8x1xf32>
    %cst_12 = arith.constant 6.400000e+01 : f32
    %29 = vector.broadcast %cst_12 : f32 to vector<8x1xf32>
    %30 = arith.divf %28, %29 : vector<8x1xf32>
    %cst_13 = arith.constant 9.99999996E-13 : f32
    %31 = vector.broadcast %cst_13 : f32 to vector<8x1xf32>
    %32 = arith.addf %30, %31 : vector<8x1xf32>
    %33 = math.rsqrt %32 : vector<8x1xf32>
    %34 = vector.broadcast %33 : vector<8x1xf32> to vector<8x64xf32>
    %35 = arith.mulf %25, %34 : vector<8x64xf32>
    %c0_14 = arith.constant 0 : index
    %c0_15 = arith.constant 0 : index
    %36 = vector.load %arg4[%c0_14, %c0_15] : memref<1x64xf32, #tpu.memory_space<vmem>>, vector<1x64xf32>
    %37 = vector.broadcast %36 : vector<1x64xf32> to vector<8x64xf32>
    %38 = arith.mulf %35, %37 : vector<8x64xf32>
    %c0_16 = arith.constant 0 : index
    %c0_17 = arith.constant 0 : index
    %39 = vector.load %arg5[%c0_16, %c0_17] : memref<1x64xf32, #tpu.memory_space<vmem>>, vector<1x64xf32>
    %40 = vector.broadcast %39 : vector<1x64xf32> to vector<8x64xf32>
    %41 = arith.addf %38, %40 : vector<8x64xf32>
    %42 = arith.truncf %41 : vector<8x64xf32> to vector<8x64xbf16>
    %c0_18 = arith.constant 0 : index
    %c0_19 = arith.constant 0 : index
    %43 = vector.load %arg6[%c0_18, %c0_19] : memref<64x128xbf16, #tpu.memory_space<vmem>>, vector<64x128xbf16>
    %cst_20 = arith.constant dense<0.000000e+00> : vector<8x128xf32>
    %44 = tpu.matmul %42, %43, %cst_20 {dimension_numbers = #tpu.dot_dimension_numbers<[1], [0], [0], [1], [0, 0, 1, 1], [], []>} : vector<8x64xbf16>, vector<64x128xbf16>, vector<8x128xf32> -> vector<8x128xf32>
    %c0_21 = arith.constant 0 : index
    %c0_22 = arith.constant 0 : index
    %45 = vector.load %arg7[%c0_21, %c0_22] : memref<1x128xf32, #tpu.memory_space<vmem>>, vector<1x128xf32>
    %46 = vector.broadcast %45 : vector<1x128xf32> to vector<8x128xf32>
    %47 = arith.addf %44, %46 : vector<8x128xf32>
    %c0_23 = arith.constant 0 : index
    %c0_24 = arith.constant 0 : index
    %48 = vector.load %arg8[%c0_23, %c0_24] : memref<8x128xf32, #tpu.memory_space<vmem>>, vector<8x128xf32>
    tpu.vector_store %arg8[%c0_23, %c0_24], %47 {strides = array<i32>} : memref<8x128xf32, #tpu.memory_space<vmem>>, vector<8x128xf32>,
    return
  }
  func.func @transform_0(%arg0: i32) -> (i32, i32) {
    %c0_i32 = arith.constant 0 : i32
    %c0_i32_0 = arith.constant 0 : i32
    return %arg0, %c0_i32 : i32, i32
  }
  func.func @transform_1(%arg0: i32) -> (i32, i32) {
    %c0_i32 = arith.constant 0 : i32
    %c0_i32_0 = arith.constant 0 : i32
    %c0_i32_1 = arith.constant 0 : i32
    return %c0_i32, %c0_i32_0 : i32, i32
  }
  func.func @transform_2(%arg0: i32) -> (i32, i32) {
    %c0_i32 = arith.constant 0 : i32
    %c0_i32_0 = arith.constant 0 : i32
    %c0_i32_1 = arith.constant 0 : i32
    return %c0_i32, %c0_i32_0 : i32, i32
  }
  func.func @transform_3(%arg0: i32) -> (i32, i32) {
    %c0_i32 = arith.constant 0 : i32
    %c0_i32_0 = arith.constant 0 : i32
    %c0_i32_1 = arith.constant 0 : i32
    return %c0_i32, %c0_i32_0 : i32, i32
  }
  func.func @transform_4(%arg0: i32) -> (i32, i32) {
    %c0_i32 = arith.constant 0 : i32
    %c0_i32_0 = arith.constant 0 : i32
    %c0_i32_1 = arith.constant 0 : i32
    return %c0_i32, %c0_i32_0 : i32, i32
  }
  func.func @transform_5(%arg0: i32) -> (i32, i32) {
    %c0_i32 = arith.constant 0 : i32
    %c0_i32_0 = arith.constant 0 : i32
    %c0_i32_1 = arith.constant 0 : i32
    return %c0_i32, %c0_i32_0 : i32, i32
  }
  func.func @transform_6(%arg0: i32) -> (i32, i32) {
    %c0_i32 = arith.constant 0 : i32
    %c0_i32_0 = arith.constant 0 : i32
    %c0_i32_1 = arith.constant 0 : i32
    return %c0_i32, %c0_i32_0 : i32, i32
  }
  func.func @transform_7(%arg0: i32) -> (i32, i32) {
    %c0_i32 = arith.constant 0 : i32
    %c0_i32_0 = arith.constant 0 : i32
    return %arg0, %c0_i32 : i32, i32
  }
}

</mosaic_0001>

<bundles_post_ra>
// kernel: _classifier_head_padded.1
= control target key start
LH: loop header
LB: loop body
LE: loop exit
PB: predicated region body
PF: predicated region fallthrough
CT: control target
= control target key end

     0   :  { %12 = vsyncpa [#allocation3], 0  ;;  %s1211_s0 = inlined_call_operand.hbm [shape: f32[16,32], index: 0, kind: input, shape index: {}]   ;;  %s1212_s1 = inlined_call_operand.hbm [shape: bf16[32,64], index: 1, kind: input, shape index: {}]   ;;  %s1213_s2 = inlined_call_operand.vmem [shape: f32[1,64], index: 2, kind: input, shape index: {}]   ;;  %s1214_s3 = inlined_call_operand.vmem [shape: f32[1,64], index: 3, kind: input, shape index: {}]   ;;  %s1215_s4 = inlined_call_operand.vmem [shape: f32[1,64], index: 4, kind: input, shape index: {}]   ;;  %s1216_s5 = inlined_call_operand.hbm [shape: bf16[64,128], index: 5, kind: input, shape index: {}]   ;;  %s1217_s6 = inlined_call_operand.vmem [shape: f32[1,128], index: 6, kind: input, shape index: {}]   ;;  %s1218_s7 = inlined_call_operand.hbm [shape: f32[16,128], index: 7, kind: output, shape index: {}]  }
   0x1   :  { %14 = vsyncpa [#allocation3 + $0x1], 0 }
   0x2   :  { %15 = vsyncpa [#allocation6], 0 }
   0x3   :  { %16 = vsyncpa [#allocation4], 0 }
   0x4   :  { %18 = vsyncpa [#allocation4 + $0x1], 0  ;;  %s963_s24 = smov 0   ;;  %s965_s25 = smov 0  }
   0x5   :  { %s967_s26 = smov 0   ;;  %s969_s27 = smov 0  }
   0x6 LB: > { %s984_s28 = sadd.s32 4294967295, %s913_s27   ;;  %s620_s29 = sadd.s32 4294967294, %s913_s27   ;;  %s913_s27 = sphi %s969_s27, %s1238_s27   ;;  %s909_s26 = sphi %s967_s26, %s1237_s26   ;;  %s905_s25 = sphi %s965_s25, %s1236_s25   ;;  %s901_s24 = sphi %s963_s24, %s1235_s24  }
   0x7   : > { %p44_p0 = scmp.ne.s32.totalorder %s905_s25, %s901_s24  ;;  %p1219_p1 = scmp.eq.s32.totalorder %s984_s28, 0 }
   0x8   : > { %p200_p3 = scmp.eq.s32.totalorder %s620_s29, 1  ;;  %p621_p5 = scmp.ge.s32.totalorder %s913_s27, 1 }
   0x9   : > { %p993_p4 = por %p1219_p1, %p44_p0  ;;  %p207_p7 = scmp.lt.s32.totalorder %s913_s27, 3 }
   0xa   : > { %p998_p6 = por %p200_p3, %p44_p0  ;;  %s915_s10 = smov [#allocation5]  }
   0xb   : > { %s1222_s30 = scalar_select %p993_p4, 1, 0 }
   0xc   : > { %s1223_s8 = scalar_select %p998_p6, 1, 0 }
   0xd   : > { %p1003_p8 = pnand %p621_p5, %p207_p7  ;;  %s219_s11 = sshll.u32 %s915_s10, 4  ;;  %s1007_s11 = int_to_ptr.vmem [resolvable:$true] %s219_s11 }
   0xe   : > { %s916_s13 = smov [#allocation7]   ;;  %s757_s17 = scalar_lea.hbm %s1212_s1, 256 }
   0xf   : > { %p688_p9 = pneg %p1003_p8  ;;  %s241_s14 = sshll.u32 %s916_s13, 4  ;;  %s1018_s14 = int_to_ptr.vmem [resolvable:$true] %s241_s14 }
  0x10   : > { %p758_p12 = scmp.ne.s32.totalorder %s1212_s1, %s757_s17  ;;  %p764_p5 = scmp.lt.u32.totalorder %s757_s17, %s1212_s1 }
  0x11   : > { %p1014_p11 = pnand %p688_p9, %p1219_p1 }
  0x13   : > { %p759_p13 = pneg %p1014_p11 }
  0x15   : > { %p760_p0 = pnand %p759_p13, %p758_p12 }
  0x17   : > { %p761_p3 = pneg %p760_p0 }
  0x19   : > { %p766_p7 = pnand %p764_p5, %p761_p3 }
  0x1b   : > { %769 = shalt.err (!%p766_p7)
}
  0x1c   : > { %s770_s22 = scalar_lea.vmem %s1007_s11, 256  ;;  %p778_p2 = scmp.lt.s32.totalorder %s1007_s11, %s1007_s11 }
  0x1d   : > { %p771_p9 = scmp.ne.s32.totalorder %s1007_s11, %s770_s22  ;;  %p779_p12 = scmp.lt.s32.totalorder %s770_s22, %s770_s22 }
  0x1f   : > { %p773_p10 = pnand %p771_p9, %p759_p13  ;;  %p780_p0 = por %p779_p12, %p778_p2 }
  0x21   : > { %p774_p1 = pneg %p773_p10 }
  0x23   : > { %p781_p6 = pnand %p780_p0, %p774_p1 }
  0x25   : > { %784 = shalt.err (!%p781_p6)
}
  0x26   : > { %s917_s23 = smov 64   ;;  %s918_s29 = smov 4  }
  0x27   : > { %691 = dma.hbm_to_vmem [thread:$0]  (!%p1014_p11), %s1212_s1, 256, %s1007_s11, [#allocation6], %s917_s23, %s917_s23, %s918_s29  }
  0x28   : > { %s785_s17 = scalar_lea.hbm %s1216_s5, 512 }
  0x29   : > { %p786_p2 = scmp.ne.s32.totalorder %s1216_s5, %s785_s17  ;;  %p792_p10 = scmp.lt.u32.totalorder %s785_s17, %s1216_s5 }
  0x2b   : > { %p788_p1 = pnand %p786_p2, %p759_p13 }
  0x2d   : > { %p789_p6 = pneg %p788_p1 }
  0x2f   : > { %p794_p3 = pnand %p792_p10, %p789_p6 }
  0x31   : > { %797 = shalt.err (!%p794_p3)
}
  0x32   : > { %s798_s11 = scalar_lea.vmem %s1018_s14, 512  ;;  %p806_p12 = scmp.lt.s32.totalorder %s1018_s14, %s1018_s14 }
  0x33   : > { %p799_p5 = scmp.ne.s32.totalorder %s1018_s14, %s798_s11  ;;  %p807_p0 = scmp.lt.s32.totalorder %s798_s11, %s798_s11 }
  0x35   : > { %p801_p7 = pnand %p799_p5, %p759_p13  ;;  %p808_p2 = por %p807_p0, %p806_p12 }
  0x37   : > { %p802_p9 = pneg %p801_p7 }
  0x39   : > { %p809_p1 = pnand %p808_p2, %p802_p9 }
  0x3b   : > { %812 = shalt.err (!%p809_p1)
}
  0x3c   : > { %694 = dma.hbm_to_vmem [thread:$0]  (!%p1014_p11), %s1216_s5, 512, %s1018_s14, [#allocation6], %s917_s23, %s917_s23, %s918_s29  }
  0x3d   : > { %s1073_s13 = sadd.s32 1, %s913_s27   ;;  %s31_s12 = sadd.s32 1, %s909_s26 }
  0x3e   : > { %s28_s15 = ssub.s32 %s913_s27, %s1073_s13  ;;  %p38_p13 = scmp.ne.s32.totalorder %s909_s26, %s905_s25 }
  0x3f   : > { %p29_p6 = scmp.eq.s32.totalorder %s28_s15, 0  ;;  %p39_p10 = scmp.eq.s32.totalorder %s913_s27, 0 }
  0x40   : > { %p1226_p3 = scmp.eq.s32.totalorder %s984_s28, 1  ;;  %p705_p7 = scmp.lt.s32.totalorder %s913_s27, 2 }
  0x41   : > { %s1089_s17 = scalar_select %p29_p6, %s909_s26, %s31_s12  }
  0x42   : > { %p1083_p5 = por %p1226_p3, %p38_p13  ;;  %p40_p9 = por %p39_p10, %p38_p13 }
  0x43   : > { %s258_s18 = sand.u32 1, %s909_s26   ;;  %s626_s14 = sshll.u32 %s913_s27, 7 }
  0x44   : > { %s1227_s16 = scalar_select %p1083_p5, 1, 0 }
  0x45   : > { %s625_s19 = sshll.u32 %s258_s18, 3  ;;  %s1096_s20 = scalar_lea.hbm %s1211_s0, %s626_s14 }
  0x46   : > { %s262_s21 = scalar_lea.vmem [#allocation2], %s625_s19  ;;  %p1100_p11 = pnand %p705_p7, %p40_p9 }
  0x47   : > { %s269_s11 = sshll.u32 %s262_s21, 4  ;;  %s259_s10 = scalar_lea.sflag [#allocation3], %s258_s18  ;;  %s1098_s11 = int_to_ptr.vmem [resolvable:$true] %s269_s11 }
  0x48   : > { %s813_s12 = scalar_lea.hbm %s1096_s20, 128  ;;  %p815_p0 = pneg %p1100_p11 }
  0x49   : > { %p814_p12 = scmp.ne.s32.totalorder %s1096_s20, %s813_s12  ;;  %s818_s14 = scalar_lea.hbm %s1211_s0, 256 }
  0x4a   : > { %p819_p13 = scmp.lt.u32.totalorder %s1096_s20, %s1211_s0  ;;  %p820_p6 = scmp.lt.u32.totalorder %s818_s14, %s813_s12 }
  0x4b   : > { %p816_p2 = pnand %p815_p0, %p814_p12  ;;  %p822_p3 = scmp.lt.u32.totalorder %s813_s12, %s1096_s20 }
  0x4c   : > { %p821_p10 = por %p820_p6, %p819_p13 }
  0x4d   : > { %p817_p1 = pneg %p816_p2 }
  0x4e   : > { %p823_p7 = por %p822_p3, %p821_p10 }
  0x50   : > { %p824_p9 = pnand %p823_p7, %p817_p1 }
  0x52   : > { %827 = shalt.err (!%p824_p9)
}
  0x53   : > { %s828_s18 = scalar_lea.vmem %s1098_s11, 128  ;;  %s919_s21 = smov [#allocation2]  }
  0x54   : > { %p829_p12 = scmp.ne.s32.totalorder %s1098_s11, %s828_s18  ;;  %s833_s15 = sshll.u32 %s919_s21, 4  ;;  %s834_s15 = int_to_ptr.vmem [resolvable:$false] %s833_s15 }
  0x55   : > { %s835_s19 = scalar_lea.vmem %s834_s15, 256  ;;  %p836_p4 = scmp.lt.s32.totalorder %s1098_s11, %s834_s15 }
  0x56   : > { %p831_p2 = pnand %p829_p12, %p815_p0  ;;  %p837_p13 = scmp.lt.s32.totalorder %s835_s19, %s828_s18 }
  0x58   : > { %p832_p5 = pneg %p831_p2  ;;  %p838_p6 = por %p837_p13, %p836_p4 }
  0x5a   : > { %p839_p10 = pnand %p838_p6, %p832_p5 }
  0x5c   : > { %842 = shalt.err (!%p839_p10)
}
  0x5d   : > { %698 = dma.hbm_to_vmem [thread:$0]  (!%p1100_p11), %s1096_s20, 128, %s1098_s11, %s259_s10  }
  0x5e   : > { %278 = sbr.rel (%p1003_p8) target bundleno = 899 (0x383), region = 48  ;;  %s1132_s12 = sand.u32 (!%p1003_p8), 1, %s905_s25  }
  0x5f   : > { %s628_s14 = sshll.u32 (!%p1003_p8), %s1132_s12, 3  ;;  %s281_s23 = scalar_lea.sflag (!%p1003_p8), [#allocation3], %s1132_s12 }
  0x60   : > { %s284_s29 = scalar_lea.vmem (!%p1003_p8), [#allocation2], %s628_s14  ;;  %p1229_p4 = scmp.ne.s32.totalorder (!%p1003_p8), %s1222_s30, 0 }
  0x65   : > { %888 = dma.done.wait (%p1229_p4), %s281_s23, 128  }
  0x66   : > { %890 = vsyncadd (%p1229_p4), %s281_s23, 4294967168  ;;  %p1230_p5 = scmp.eq.s32.totalorder %s984_s28, 0 }
  0x68   : > { %892 = dma.done.wait (%p1230_p5), [#allocation6], 768   ;;  %p1231_p8 = pmov %p1230_p5 }
  0x69   : > { %v920_v0 = vmov 0.0   ;;  %vm921_vm0 = vmmov 0   ;;  %v747_v1 = vld [vmem:[#allocation5] sm:$0xff]   ;;  %v748_v2 = vld [vmem:[#allocation5 + $0x8] sm:$0xff]   ;;  %v324_v3 = vld [vmem:[%s284_s29] sm:$0xff]  ;;  %vm349_vm1 = vcmask 261120  }
  0x6a   : > { %894 = vsyncadd (%p1231_p8), [#allocation6], 4294966528  ;;  %656 = vmatprep.subr.bf16.mxu0 %v920_v0  ;;  %660 = vmatprep.mubr.msk.bf16.mxu0 %vm921_vm0, %v920_v0  ;;  %v325_v4 = vpack.c.bf16 %v324_v3, %v324_v3  ;;  %v632_v5 = vld [vmem:[%s1213_s2] ss:$0 sm:$0xff]  ;;  %vm402_vm2 = vcmask 523264   ;;  %v750_v27 = vld [vmem:[#allocation7 + $0x8] sm:$0xff]  }
  0x6b   : > { %664 = vmatprep.subr.bf16.mxu1 %v920_v0  ;;  %672 = vmatprep.mubr.msk.bf16.mxu1 %vm921_vm0, %v920_v0  ;;  %v749_v26 = vld [vmem:[#allocation7] sm:$0xff]   ;;  %v751_v28 = vld [vmem:[#allocation7 + $0x10] sm:$0xff]   ;;  %v752_v29 = vld [vmem:[#allocation7 + $0x18] sm:$0xff]   ;;  %s645_s15 = sshll.u32 %s984_s28, 7  ;;  %s322_s19 = scalar_lea.vmem [#allocation8], %s628_s14 }
  0x6c   : > { %657 = vmatpush3.bf16.msra.mxu0 %v747_v1  ;;  %665 = vmatpush3.bf16.msra.mxu1 %v749_v26  ;;  %v636_v34 = vld [vmem:[%s1214_s3] ss:$0 sm:$0xff]  ;;  %s531_s23 = sshll.u32 %s322_s19, 4  ;;  %s1167_s9 = scalar_lea.hbm %s1218_s7, %s645_s15  ;;  %s1169_s23 = int_to_ptr.vmem [resolvable:$true] %s531_s23 }
  0x6d   : > { %658 = vmatprep.subr.bf16.mxu0 %v920_v0  ;;  %666 = vmatprep.subr.bf16.mxu1 %v920_v0  ;;  %v637_v36 = vld [vmem:[%s1215_s4] ss:$0 sm:$0xff]  ;;  %s518_s28 = scalar_lea.sflag [#allocation4], %s1132_s12  ;;  %s843_s20 = scalar_lea.vmem %s1169_s23, 128 }
  0x6e   : > { %v638_v40 = vld [vmem:[%s1217_s6] ss:$0 sm:$0xff]  ;;  %p844_p11 = scmp.ne.s32.totalorder %s1169_s23, %s843_s20  ;;  %p1232_p0 = scmp.ne.s32.totalorder %s1227_s16, 0 }
  0x6f   : > { %s922_s14 = smov [#allocation8]  }
  0x70   : > { %659 = vmatpush3.bf16.msra.mxu0 %v748_v2  ;;  %667 = vmatpush3.bf16.msra.mxu1 %v750_v27  ;;  %p845_p1 = pnand %p844_p11, %p1232_p0  ;;  %s847_s11 = sshll.u32 %s922_s14, 4  ;;  %s848_s11 = int_to_ptr.vmem [resolvable:$false] %s847_s11 }
  0x71   : > { %668 = vmatprep.subr.bf16.mxu1 %v920_v0  ;;  %s849_s22 = scalar_lea.vmem %s848_s11, 256  ;;  %p850_p7 = scmp.lt.s32.totalorder %s1169_s23, %s848_s11 }
  0x72   : > { %p846_p3 = pneg %p845_p1  ;;  %p851_p9 = scmp.lt.s32.totalorder %s849_s22, %s843_s20 }
  0x73   : > { %661 = vmatmul.mubr.msk.bf16.vlgmr.msra.gmra.mrb[0].mxu0 %vm349_vm1, %v325_v4 }
  0x74   : > { %669 = vmatpush3.bf16.msra.mxu1 %v751_v28  ;;  %p852_p12 = por %p851_p9, %p850_p7 }
  0x75   : > { %670 = vmatprep.subr.bf16.mxu1 %v920_v0 }
  0x76   : > { %p853_p2 = pnand %p852_p12, %p846_p3 }
  0x78   : > { %671 = vmatpush3.bf16.msra.mxu1 %v752_v29 }
 0x146   : > { %v387_v6 = vpop.f32.mrb[0].mxu0 }
 0x147   : > { %v388_v7 = vadd.f32 %v632_v5, %v387_v6  ;;  %v662_v8 = vpop.f32.mrb[1].mxu0 }
 0x148   : > { %v390_v9 = vpop.f32.mrb[2].mxu0 }
 0x149   : > { %v393_v10 = vmul.f32 %v388_v7, %v388_v7  ;;  %v663_v11 = vpop.f32.mrb[3].mxu0 }
 0x14b   : > { %v394_v12 = vmul.f32 %v393_v10, %v388_v7 }
 0x14d   : > { %v395_v13 = vmul.f32 0.044715, %v394_v12 }
 0x14f   : > { %v396_v14 = vadd.f32 %v395_v13, %v388_v7 }
 0x151   : > { %v397_v15 = vmul.f32 0.7978846, %v396_v14 }
 0x153   : > { %753 = vtanh.f32 %v397_v15 }
 0x15d   : > { %v754_v16 = vpop.eup %753 }
 0x15e   : > { %v399_v17 = vadd.f32 1.0, %v754_v16 }
 0x160   : > { %v400_v18 = vmul.f32 0.5, %v399_v17 }
 0x162   : > { %v401_v19 = vmul.f32 %v400_v18, %v388_v7 }
 0x164   : > { %v403_v20 = vsel %vm402_vm2, %v401_v19, 0.0 }
 0x165   : > { %404 = vadd.xlane.f32.xlu0 %v403_v20 }
 0x1f2   : > { %v405_v21 = vpop.xlane.xlu0 %404 }
 0x1f3   : > { %v407_v22 = vmul.f32 0.015625, %v405_v21 }
 0x1f5   : > { %v408_v23 = vsub.f32 %v401_v19, %v407_v22 }
 0x1f7   : > { %v409_v24 = vmul.f32 %v408_v23, %v408_v23 }
 0x1f9   : > { %v410_v25 = vsel %vm402_vm2, %v409_v24, 0.0 }
 0x1fa   : > { %411 = vadd.xlane.f32.xlu0 %v410_v25 }
 0x287   : > { %v412_v30 = vpop.xlane.xlu0 %411 }
 0x288   : > { %v413_v31 = vmul.f32 0.015625, %v412_v30 }
 0x28a   : > { %v414_v32 = vadd.f32 1e-12, %v413_v31 }
 0x28c   : > { %755 = vrsqrt.f32 %v414_v32 }
 0x296   : > { %v756_v33 = vpop.eup %755 }
 0x297   : > { %v416_v35 = vmul.f32 %v756_v33, %v408_v23 }
 0x299   : > { %v424_v37 = vmul.f32 %v636_v34, %v416_v35 }
 0x29b   : > { %v432_v38 = vadd.f32 %v637_v36, %v424_v37 }
 0x29d   : > { %v433_v39 = vpack.c.bf16 %v432_v38, %v432_v38 }
 0x29f   : > { %673 = vmatmul.mubr.msk.bf16.vlgmr.msra.gmra.mrb[0].mxu1 %vm402_vm2, %v433_v39 }
 0x372   : > { %v510_v41 = vpop.f32.mrb[0].mxu1 }
 0x373   : > { %v511_v42 = vadd.f32 %v638_v40, %v510_v41  ;;  %v674_v43 = vpop.f32.mrb[1].mxu1 }
 0x374   : > { %v513_v44 = vpop.f32.mrb[2].mxu1 }
 0x375   : > { %516 = vst [vmem:[%s322_s19] sm:$0xff] %v511_v42  ;;  %v675_v45 = vpop.f32.mrb[3].mxu1 }
 0x376   : > { %856 = shalt.err (!%p853_p2)
}
 0x377   : > { %s857_s12 = scalar_lea.hbm %s1167_s9, 128  ;;  %s861_s21 = scalar_lea.hbm %s1218_s7, 256 }
 0x378   : > { %p858_p13 = scmp.ne.s32.totalorder %s1167_s9, %s857_s12  ;;  %p862_p4 = scmp.lt.u32.totalorder %s1167_s9, %s1218_s7 }
 0x379   : > { %p863_p5 = scmp.lt.u32.totalorder %s861_s21, %s857_s12  ;;  %p865_p11 = scmp.lt.u32.totalorder %s857_s12, %s1167_s9 }
 0x37a   : > { %p859_p6 = pnand %p858_p13, %p1232_p0 }
 0x37b   : > { %p864_p8 = por %p863_p5, %p862_p4 }
 0x37c   : > { %p860_p10 = pneg %p859_p6 }
 0x37d   : > { %p866_p1 = por %p865_p11, %p864_p8 }
 0x37f   : > { %p867_p3 = pnand %p866_p1, %p860_p10 }
 0x381   : > { %870 = shalt.err (!%p867_p3)
}
 0x382   : > { %686 = dma.vmem_to_hbm [thread:$0]  (%p1232_p0), %s1169_s23, 128, %s1167_s9, %s518_s28  }
 0x383 PF: > { %s543_s29 = sand.u32 1, %s901_s24   ;;  %p1233_p7 = scmp.ne.s32.totalorder %s1223_s8, 0 }
 0x384   : > { %p1234_p9 = scmp.ge.s32.totalorder %s913_s27, 2  ;;  %s544_s30 = scalar_lea.sflag [#allocation4], %s543_s29 }
 0x386   : > { %p700_p12 = pnand %p1234_p9, %p1233_p7 }
 0x388   : > { %896 = dma.done.wait (!%p700_p12), %s544_s30, 128  }
 0x389   : > { %898 = vsyncadd (!%p700_p12), %s544_s30, 4294967168  ;;  %p21_p2 = scmp.ge.s32.totalorder %s1073_s13, 4   ;;  %s1235_s24 = smov %s905_s25 }
 0x38a   : > { %s1236_s25 = smov %s909_s26  ;;  %s1237_s26 = smov %s1089_s17 }
 0x38b   : > { %s1238_s27 = smov %s1073_s13  ;;  %23 = sbr.rel (!%p21_p2) target bundleno = 6 (0x6), region = 101 }
 0x392   :  { %549 = vsyncpa [#allocation3], 1 }
 0x393   :  { %551 = vsyncpa [#allocation3 + $0x1], 1 }
 0x394   :  { %552 = vsyncpa [#allocation6], 1 }
 0x395   :  { %553 = vsyncpa [#allocation4], 1 }
 0x396   :  { %555 = vsyncpa [#allocation4 + $0x1], 1 }

</bundles_post_ra>
